<compile_context>
chip_gen: v7x
topology: tpu7x:2x2x1
jax: 0.10.0
libtpu: 0.0.40
codegen_flags: <defaults>
</compile_context>

<pallas_src>
import jax
import jax.numpy as jnp
from jax.experimental import pallas as pl
from jax.experimental.pallas import tpu as pltpu

_STATE_DIM = 3
_ACTION_DIM = 1
_HIDDEN = 100
_PALLAS_MIN_BATCH = 2048  # below this, plain XLA beats the pallas_call launch cost


def _round_up(x, m):
    return (x + m - 1) // m * m


def critic_kernel(s_ref, a_ref, w1s_ref, w1a_ref, b1_ref, w2_ref, b2_ref, out_ref):
    """Fused critic MLP on one batch tile (batch on the lane axis).

    s_ref:   (3, TB)    state tile
    a_ref:   (1, TB)    action tile
    w1s_ref: (100, 3)   fc weight columns for the state features
    w1a_ref: (100, 1)   fc weight column for the action feature
    b1_ref:  (100, 1)   fc bias (broadcast over lanes)
    w2_ref:  (100, 1)   v_head weight (broadcast over lanes)
    b2_ref:  (1,)       v_head bias, SMEM scalar
    out_ref: (1, TB)    state value tile
    """
    s = s_ref[...]
    a = a_ref[...]

    # Hidden layer: (100,3) @ (3,TB) on the MXU + rank-1 action term on the VPU.
    h = jnp.dot(w1s_ref[...], s, preferred_element_type=jnp.float32)
    h = h + w1a_ref[...] * a          # (100,1) * (1,TB) broadcast
    h = h + b1_ref[...]               # (100,TB) + (100,1) broadcast
    h = jnp.maximum(h, 0.0)           # ReLU (VPU)

    # Value head: VPU multiply + sublane reduction (XLU) instead of an M=1 matmul.
    v = jnp.sum(h * w2_ref[...], axis=0, keepdims=True)   # (1, TB), f32 accum
    out_ref[...] = (v + b2_ref[0]).astype(out_ref.dtype)


def critic_forward_pallas(s, a, params, *, tb=1024):
    """Pallas path: batch-tiled, lane-dense layout."""
    B = s.shape[0]
    assert s.shape[1] == _STATE_DIM and a.shape[1] == _ACTION_DIM

    # Layout plumbing in the wrapper: put the batch on the lane axis.
    s_t = s.T.astype(jnp.float32)                     # (3, B)
    a_t = a.T.astype(jnp.float32)                     # (1, B)

    tb = int(min(tb, _round_up(max(B, 1), 128)))      # lane-dense tile, >=128
    B_pad = _round_up(B, tb)
    if B_pad != B:
        pad = B_pad - B
        s_t = jnp.pad(s_t, ((0, 0), (0, pad)))        # padded cols sliced off below
        a_t = jnp.pad(a_t, ((0, 0), (0, pad)))

    w1 = params["fc_w"].astype(jnp.float32)           # (100, 4), PyTorch layout
    w1_s = w1[:, :_STATE_DIM]                         # (100, 3)
    w1_a = w1[:, _STATE_DIM:]                         # (100, 1)
    b1 = params["fc_b"].astype(jnp.float32).reshape(_HIDDEN, 1)
    w2 = params["v_w"].astype(jnp.float32).reshape(_HIDDEN, 1)
    b2 = params["v_b"].astype(jnp.float32).reshape(1)

    grid = (B_pad // tb,)

    out_t = pl.pallas_call(
        critic_kernel,
        out_shape=jax.ShapeDtypeStruct((1, B_pad), jnp.float32),
        grid=grid,
        in_specs=[
            pl.BlockSpec((_STATE_DIM, tb), lambda i: (0, i)),   # s tile
            pl.BlockSpec((_ACTION_DIM, tb), lambda i: (0, i)),  # a tile
            pl.BlockSpec((_HIDDEN, _STATE_DIM), lambda i: (0, 0)),
            pl.BlockSpec((_HIDDEN, 1), lambda i: (0, 0)),
            pl.BlockSpec((_HIDDEN, 1), lambda i: (0, 0)),
            pl.BlockSpec((_HIDDEN, 1), lambda i: (0, 0)),
            pl.BlockSpec(memory_space=pltpu.MemorySpace.SMEM),  # b2 scalar
        ],
        out_specs=pl.BlockSpec((1, tb), lambda i: (0, i)),
        compiler_params=pltpu.CompilerParams(
            dimension_semantics=("parallel",),  # shard batch tiles across v7x's 2 TCs
        ),
    )(s_t, a_t, w1_s, w1_a, b1, w2, b2)

    return out_t[:, :B].reshape(B, 1)


def reference_forward(s, a, params):
    """Pure-JAX reference (also the small-batch fast path)."""
    x = jnp.concatenate([s, a], axis=1)
    h = jnp.maximum(x @ params["fc_w"].T + params["fc_b"], 0.0)
    return h @ params["v_w"].T + params["v_b"]


def critic_forward(s, a, params):
    """Gated entry point: plain XLA below a few thousand rows, Pallas above."""
    if s.shape[0] < _PALLAS_MIN_BATCH:
        return reference_forward(s, a, params)
    return critic_forward_pallas(s, a, params)


def init_params(key):
    """PyTorch-default Linear init: U(-1/sqrt(fan_in), 1/sqrt(fan_in))."""
    k1, k2, k3, k4 = jax.random.split(key, 4)
    bound1 = 1.0 / jnp.sqrt(4.0)
    bound2 = 1.0 / jnp.sqrt(100.0)
    return {
        "fc_w": jax.random.uniform(k1, (_HIDDEN, 4), jnp.float32, -bound1, bound1),
        "fc_b": jax.random.uniform(k2, (_HIDDEN,), jnp.float32, -bound1, bound1),
        "v_w": jax.random.uniform(k3, (1, _HIDDEN), jnp.float32, -bound2, bound2),
        "v_b": jax.random.uniform(k4, (1,), jnp.float32, -bound2, bound2),
    }


if __name__ == "__main__":
    key = jax.random.PRNGKey(0)
    kp, ks1, ka1, ks2, ka2 = jax.random.split(key, 5)

    params = init_params(kp)

    # Small-batch check (single tile, padded 8 -> 128 lanes).
    B1 = 8
    s1 = jax.random.normal(ks1, (B1, _STATE_DIM), jnp.float32)
    a1 = jax.random.normal(ka1, (B1, _ACTION_DIM), jnp.float32)
    out1 = jax.block_until_ready(critic_forward_pallas(s1, a1, params))
    ref1 = reference_forward(s1, a1, params)
    assert out1.shape == (B1, 1)
    assert jnp.allclose(out1, ref1, atol=1e-5, rtol=1e-5), "mismatch vs reference (B=8)"

    # Multi-tile + ragged-tail check (260 rows, TB=128 -> grid of 3 steps).
    B2 = 260
    s2 = jax.random.normal(ks2, (B2, _STATE_DIM), jnp.float32)
    a2 = jax.random.normal(ka2, (B2, _ACTION_DIM), jnp.float32)
    out2 = jax.block_until_ready(critic_forward_pallas(s2, a2, params, tb=128))
    ref2 = reference_forward(s2, a2, params)
    assert out2.shape == (B2, 1)
    assert jnp.allclose(out2, ref2, atol=1e-5, rtol=1e-5), "mismatch vs reference (B=260)"

    print("KERNEL_OK")
</pallas_src>

<mosaic_0001>
module attributes {stable_mosaic.version = 11 : i64} {
  func.func @critic_kernel(%arg0: i32, %arg1: memref<3x128xf32, #tpu.memory_space<vmem>>, %arg2: memref<1x128xf32, #tpu.memory_space<vmem>>, %arg3: memref<100x3xf32, #tpu.memory_space<vmem>>, %arg4: memref<100x1xf32, #tpu.memory_space<vmem>>, %arg5: memref<100x1xf32, #tpu.memory_space<vmem>>, %arg6: memref<100x1xf32, #tpu.memory_space<vmem>>, %arg7: memref<1xf32, #tpu.memory_space<smem>>, %arg8: memref<1x128xf32, #tpu.memory_space<vmem>>) attributes {dimension_semantics = [#tpu.dimension_semantics<parallel>], iteration_bounds = array<i64: 1>, scalar_prefetch = 0 : i64, scratch_operands = 0 : i64, tpu.core_type = #tpu.core_type<tc>, window_params = [{transform_indices = @transform_0, window_bounds = array<i64: 3, 128>}, {transform_indices = @transform_1, window_bounds = array<i64: 1, 128>}, {pipeline_mode = #tpu.pipeline_mode<synchronous>, transform_indices = @transform_2, window_bounds = array<i64: 100, 3>}, {pipeline_mode = #tpu.pipeline_mode<synchronous>, transform_indices = @transform_3, window_bounds = array<i64: 100, 1>}, {pipeline_mode = #tpu.pipeline_mode<synchronous>, transform_indices = @transform_4, window_bounds = array<i64: 100, 1>}, {pipeline_mode = #tpu.pipeline_mode<synchronous>, transform_indices = @transform_5, window_bounds = array<i64: 100, 1>}, {transform_indices = @transform_6, window_bounds = array<i64: 1>}, {transform_indices = @transform_7, window_bounds = array<i64: 1, 128>}]} {
    %c0 = arith.constant 0 : index
    %c0_0 = arith.constant 0 : index
    %0 = vector.load %arg1[%c0, %c0_0] : memref<3x128xf32, #tpu.memory_space<vmem>>, vector<3x128xf32>
    %c0_1 = arith.constant 0 : index
    %c0_2 = arith.constant 0 : index
    %1 = vector.load %arg2[%c0_1, %c0_2] : memref<1x128xf32, #tpu.memory_space<vmem>>, vector<1x128xf32>
    %c0_3 = arith.constant 0 : index
    %c0_4 = arith.constant 0 : index
    %2 = vector.load %arg3[%c0_3, %c0_4] : memref<100x3xf32, #tpu.memory_space<vmem>>, vector<100x3xf32>
    %cst = arith.constant dense<0.000000e+00> : vector<100x128xf32>
    %3 = tpu.matmul %2, %0, %cst {dimension_numbers = #tpu.dot_dimension_numbers<[1], [0], [0], [1], [0, 0, 1, 1], [], []>} : vector<100x3xf32>, vector<3x128xf32>, vector<100x128xf32> -> vector<100x128xf32>
    %c0_5 = arith.constant 0 : index
    %c0_6 = arith.constant 0 : index
    %4 = vector.load %arg4[%c0_5, %c0_6] : memref<100x1xf32, #tpu.memory_space<vmem>>, vector<100x1xf32>
    %5 = vector.broadcast %4 : vector<100x1xf32> to vector<100x128xf32>
    %6 = vector.broadcast %1 : vector<1x128xf32> to vector<100x128xf32>
    %7 = arith.mulf %5, %6 : vector<100x128xf32>
    %8 = arith.addf %3, %7 : vector<100x128xf32>
    %c0_7 = arith.constant 0 : index
    %c0_8 = arith.constant 0 : index
    %9 = vector.load %arg5[%c0_7, %c0_8] : memref<100x1xf32, #tpu.memory_space<vmem>>, vector<100x1xf32>
    %10 = vector.broadcast %9 : vector<100x1xf32> to vector<100x128xf32>
    %11 = arith.addf %8, %10 : vector<100x128xf32>
    %cst_9 = arith.constant 0.000000e+00 : f32
    %12 = vector.broadcast %cst_9 : f32 to vector<100x128xf32>
    %13 = arith.maximumf %11, %12 : vector<100x128xf32>
    %c0_10 = arith.constant 0 : index
    %c0_11 = arith.constant 0 : index
    %14 = vector.load %arg6[%c0_10, %c0_11] : memref<100x1xf32, #tpu.memory_space<vmem>>, vector<100x1xf32>
    %15 = vector.broadcast %14 : vector<100x1xf32> to vector<100x128xf32>
    %16 = arith.mulf %13, %15 : vector<100x128xf32>
    %cst_12 = arith.constant dense<0.000000e+00> : vector<128xf32>
    %17 = vector.multi_reduction <add>, %16, %cst_12 [0] : vector<100x128xf32> to vector<128xf32>
    %18 = vector.shape_cast %17 : vector<128xf32> to vector<1x128xf32>
    %c0_13 = arith.constant 0 : index
    %19 = memref.load %arg7[%c0_13] : memref<1xf32, #tpu.memory_space<smem>>
    %20 = vector.broadcast %19 : f32 to vector<1x128xf32>
    %21 = arith.addf %18, %20 : vector<1x128xf32>
    %c0_14 = arith.constant 0 : index
    %c0_15 = arith.constant 0 : index
    %22 = vector.load %arg8[%c0_14, %c0_15] : memref<1x128xf32, #tpu.memory_space<vmem>>, vector<1x128xf32>
    tpu.vector_store %arg8[%c0_14, %c0_15], %21 {strides = array<i32>} : memref<1x128xf32, #tpu.memory_space<vmem>>, vector<1x128xf32>,
    return
  }
  func.func @transform_0(%arg0: i32) -> (i32, i32) {
    %c0_i32 = arith.constant 0 : i32
    %c0_i32_0 = arith.constant 0 : i32
    return %c0_i32, %arg0 : i32, i32
  }
  func.func @transform_1(%arg0: i32) -> (i32, i32) {
    %c0_i32 = arith.constant 0 : i32
    %c0_i32_0 = arith.constant 0 : i32
    return %c0_i32, %arg0 : i32, i32
  }
  func.func @transform_2(%arg0: i32) -> (i32, i32) {
    %c0_i32 = arith.constant 0 : i32
    %c0_i32_0 = arith.constant 0 : i32
    %c0_i32_1 = arith.constant 0 : i32
    return %c0_i32, %c0_i32_0 : i32, i32
  }
  func.func @transform_3(%arg0: i32) -> (i32, i32) {
    %c0_i32 = arith.constant 0 : i32
    %c0_i32_0 = arith.constant 0 : i32
    %c0_i32_1 = arith.constant 0 : i32
    return %c0_i32, %c0_i32_0 : i32, i32
  }
  func.func @transform_4(%arg0: i32) -> (i32, i32) {
    %c0_i32 = arith.constant 0 : i32
    %c0_i32_0 = arith.constant 0 : i32
    %c0_i32_1 = arith.constant 0 : i32
    return %c0_i32, %c0_i32_0 : i32, i32
  }
  func.func @transform_5(%arg0: i32) -> (i32, i32) {
    %c0_i32 = arith.constant 0 : i32
    %c0_i32_0 = arith.constant 0 : i32
    %c0_i32_1 = arith.constant 0 : i32
    return %c0_i32, %c0_i32_0 : i32, i32
  }
  func.func @transform_6(%arg0: i32) -> i32 {
    %c0_i32 = arith.constant 0 : i32
    %c0_i32_0 = arith.constant 0 : i32
    return %c0_i32 : i32
  }
  func.func @transform_7(%arg0: i32) -> (i32, i32) {
    %c0_i32 = arith.constant 0 : i32
    %c0_i32_0 = arith.constant 0 : i32
    return %c0_i32, %arg0 : i32, i32
  }
}

</mosaic_0001>

<bundles_post_ra>
// kernel: tpu_custom_call.1
= control target key start
LH: loop header
LB: loop body
LE: loop exit
PB: predicated region body
PF: predicated region fallthrough
CT: control target
= control target key end

     0   :  { %v649_v0 = vmov 0.0   ;;  %v650_v3 = vmov 0   ;;  %vm180_vm0 = vcmask 1042432   ;;  %vm651_vm1 = vmmov 0   ;;  %s974_s0 = inlined_call_operand.vmem [shape: f32[3,128], index: 0, kind: input, shape index: {}]   ;;  %s975_s1 = inlined_call_operand.vmem [shape: f32[1,128], index: 1, kind: input, shape index: {}]   ;;  %s976_s2 = inlined_call_operand.vmem [shape: f32[100,3], index: 2, kind: input, shape index: {}]   ;;  %s977_s3 = inlined_call_operand.vmem [shape: f32[100,1], index: 3, kind: input, shape index: {}]   ;;  %s978_s4 = inlined_call_operand.vmem [shape: f32[100,1], index: 4, kind: input, shape index: {}]   ;;  %s979_s5 = inlined_call_operand.vmem [shape: f32[100,1], index: 5, kind: input, shape index: {}]   ;;  %s980_s6 = inlined_call_operand.<no memory space> [shape: f32[1], index: 6, kind: input, shape index: {}]   ;;  %s981_s7 = inlined_call_operand.hbm [shape: f32[1,128], index: 7, kind: output, shape index: {}]  }
   0x1   :  { %576 = vmatprep.subr.mxu0 %v649_v0  ;;  %617 = vmatprep.subr.mxu1 %v649_v0  ;;  %v45_v1 = vld [vmem:[%s977_s3 + $0x10] sm:$0xff]  ;;  %v43_v2 = vld [vmem:[%s977_s3] sm:$0xff]  ;;  %vm140_vm2 = vcmask 23552   ;;  %v37_v6 = vld [vmem:[%s976_s2 + $0x38] sm:$0xff] }
   0x2   :  { %624 = vset.pattern.permute.xlu1 %v650_v3  ;;  %623 = vset.pattern.permute.xlu0 %v650_v3  ;;  %v28_v4 = vld [vmem:[%s974_s0] sm:$0x7]  ;;  %v46_v7 = vld [vmem:[%s977_s3 + $0x18] sm:$0xff]  ;;  %v44_v8 = vld [vmem:[%s977_s3 + $0x8] sm:$0xff] }
   0x3   :  { %578 = vmatprep.mubr.msk.f32.mxu0 %vm651_vm1, %v649_v0  ;;  %599 = vmatprep.mubr.msk.f32.mxu1 %vm651_vm1, %v649_v0  ;;  %v30_v5 = vld [vmem:[%s976_s2] sm:$0xff]  ;;  %v31_v9 = vld [vmem:[%s976_s2 + $0x8] sm:$0xff]  ;;  %v32_v13 = vld [vmem:[%s976_s2 + $0x10] sm:$0xff] }
   0x4   :  { %68 = vperm.xlu1 %624, %v45_v1   ;;  %58 = vperm.xlu0 %623, %v43_v2   ;;  %v38_v10 = vld [vmem:[%s976_s2 + $0x40] sm:$0xff]  ;;  %v48_v11 = vld [vmem:[%s977_s3 + $0x28] sm:$0xff]  ;;  %v50_v15 = vld [vmem:[%s977_s3 + $0x38] sm:$0xff] }
   0x5   :  { %577 = vmatpush3.msk.msra.mxu0 %vm180_vm0, %v28_v4  ;;  %618 = vmatpush3.msk.msra.mxu1 %vm180_vm0, %v28_v4  ;;  %v47_v12 = vld [vmem:[%s977_s3 + $0x20] sm:$0xff]  ;;  %v39_v14 = vld [vmem:[%s976_s2 + $0x48] sm:$0xff]  ;;  %v49_v16 = vld [vmem:[%s977_s3 + $0x30] sm:$0xff] }
   0x6   :  { %579 = vmatmul.mubr.msk.f32.vlgmr.msra.gmra.mrb[0].mxu0 %vm140_vm2, %v30_v5  ;;  %600 = vmatmul.mubr.msk.f32.vlgmr.msra.gmra.mrb[0].mxu1 %vm140_vm2, %v37_v6  ;;  %v33_v17 = vld [vmem:[%s976_s2 + $0x18] sm:$0xff]  ;;  %v40_v18 = vld [vmem:[%s976_s2 + $0x50] sm:$0xff]  ;;  %v52_v19 = vld [vmem:[%s977_s3 + $0x48] sm:$0xff] }
   0x7   :  { %581 = vmatprep.mubr.msk.f32.mxu0 %vm651_vm1, %v649_v0  ;;  %602 = vmatprep.mubr.msk.f32.mxu1 %vm651_vm1, %v649_v0  ;;  %v51_v20 = vld [vmem:[%s977_s3 + $0x40] sm:$0xff] }
   0x8   :  { %73 = vperm.xlu1 %624, %v46_v7   ;;  %63 = vperm.xlu0 %623, %v44_v8  }
   0xa   :  { %582 = vmatmul.mubr.msk.f32.gmra.mrb[2].mxu0 %vm140_vm2, %v31_v9  ;;  %603 = vmatmul.mubr.msk.f32.gmra.mrb[2].mxu1 %vm140_vm2, %v38_v10 }
   0xb   :  { %584 = vmatprep.mubr.msk.f32.mxu0 %vm651_vm1, %v649_v0  ;;  %605 = vmatprep.mubr.msk.f32.mxu1 %vm651_vm1, %v649_v0 }
   0xc   :  { %83 = vperm.xlu1 %624, %v48_v11   ;;  %78 = vperm.xlu0 %623, %v47_v12  }
   0xe   :  { %585 = vmatmul.mubr.msk.f32.gmra.mrb[4].mxu0 %vm140_vm2, %v32_v13  ;;  %606 = vmatmul.mubr.msk.f32.gmra.mrb[4].mxu1 %vm140_vm2, %v39_v14 }
   0xf   :  { %587 = vmatprep.mubr.msk.f32.mxu0 %vm651_vm1, %v649_v0  ;;  %608 = vmatprep.mubr.msk.f32.mxu1 %vm651_vm1, %v649_v0 }
  0x10   :  { %93 = vperm.xlu1 %624, %v50_v15   ;;  %88 = vperm.xlu0 %623, %v49_v16  }
  0x12   :  { %588 = vmatmul.mubr.msk.f32.gmra.mrb[6].mxu0 %vm140_vm2, %v33_v17  ;;  %609 = vmatmul.mubr.msk.f32.gmra.mrb[6].mxu1 %vm140_vm2, %v40_v18 }
  0x13   :  { %13 = vsyncpa [#allocation4], 0  ;;  %590 = vmatprep.mubr.msk.f32.mxu0 %vm651_vm1, %v649_v0  ;;  %611 = vmatprep.mubr.msk.f32.mxu1 %vm651_vm1, %v649_v0  ;;  %v34_v21 = vld [vmem:[%s976_s2 + $0x20] sm:$0xff]  ;;  %v41_v22 = vld [vmem:[%s976_s2 + $0x58] sm:$0xff]  ;;  %vm520_vm3 = vcmask 1043456   ;;  %s652_s9 = smov [#allocation3]  }
  0x14   :  { %103 = vperm.xlu1 %624, %v52_v19   ;;  %98 = vperm.xlu0 %623, %v51_v20   ;;  %v54_v23 = vld [vmem:[%s977_s3 + $0x58] sm:$0xff]  ;;  %v53_v24 = vld [vmem:[%s977_s3 + $0x50] sm:$0xff]  ;;  %v35_v25 = vld [vmem:[%s976_s2 + $0x28] sm:$0xff]  ;;  %s539_s10 = sshll.u32 %s652_s9, 4  ;;  %s540_s10 = int_to_ptr.vmem [resolvable:$true] %s539_s10 }
  0x15   :  { %v42_v26 = vld [vmem:[%s976_s2 + $0x60] sm:$0xf]  ;;  %v315_v27 = vld [vmem:[%s978_s4 + $0x8] sm:$0xff]  ;;  %v36_v29 = vld [vmem:[%s976_s2 + $0x30] sm:$0xff]  ;;  %s625_s0 = scalar_lea.vmem %s540_s10, 16  ;;  %s629_s11 = scalar_lea.vmem %s540_s10, 32 }
  0x16   :  { %591 = vmatmul.mubr.msk.f32.gmra.mrb[8].mxu0 %vm140_vm2, %v34_v21  ;;  %612 = vmatmul.mubr.msk.f32.gmra.mrb[8].mxu1 %vm140_vm2, %v41_v22  ;;  %v314_v28 = vld [vmem:[%s978_s4] sm:$0xff]  ;;  %v317_v30 = vld [vmem:[%s978_s4 + $0x18] sm:$0xff]  ;;  %v316_v31 = vld [vmem:[%s978_s4 + $0x10] sm:$0xff]  ;;  %p626_p0 = scmp.ne.s32.totalorder %s540_s10, %s625_s0  ;;  %p630_p1 = scmp.lt.s32.totalorder %s540_s10, %s540_s10 }
  0x17   :  { %593 = vmatprep.mubr.msk.f32.mxu0 %vm651_vm1, %v649_v0  ;;  %614 = vmatprep.mubr.msk.f32.mxu1 %vm651_vm1, %v649_v0  ;;  %v419_v32 = vld [vmem:[%s979_s5 + $0x8] sm:$0xff]  ;;  %v418_v33 = vld [vmem:[%s979_s5] sm:$0xff]  ;;  %v420_v34 = vld [vmem:[%s979_s5 + $0x10] sm:$0xff]  ;;  %p631_p2 = scmp.lt.s32.totalorder %s629_s11, %s625_s0 }
  0x18   :  { %113 = vperm.xlu1 %624, %v54_v23   ;;  %108 = vperm.xlu0 %623, %v53_v24   ;;  %v318_v35 = vld [vmem:[%s978_s4 + $0x20] sm:$0xff]  ;;  %v421_v36 = vld [vmem:[%s979_s5 + $0x18] sm:$0xff]  ;;  %v319_v37 = vld [vmem:[%s978_s4 + $0x28] sm:$0xff] }
  0x19   :  { %v422_v38 = vld [vmem:[%s979_s5 + $0x20] sm:$0xff]  ;;  %v320_v39 = vld [vmem:[%s978_s4 + $0x30] sm:$0xff]  ;;  %v423_v40 = vld [vmem:[%s979_s5 + $0x28] sm:$0xff]  ;;  %p632_p3 = por %p631_p2, %p630_p1 }
  0x1a   :  { %594 = vmatmul.mubr.msk.f32.gmra.mrb[10].mxu0 %vm140_vm2, %v35_v25  ;;  %615 = vmatmul.mubr.msk.f32.gmra.mrb[10].mxu1 %vm140_vm2, %v42_v26  ;;  %v321_v41 = vld [vmem:[%s978_s4 + $0x38] sm:$0xff]  ;;  %v424_v42 = vld [vmem:[%s979_s5 + $0x30] sm:$0xff]  ;;  %v322_v43 = vld [vmem:[%s978_s4 + $0x40] sm:$0xff] }
  0x1b   :  { %596 = vmatprep.mubr.msk.f32.mxu0 %vm651_vm1, %v649_v0  ;;  %v425_v44 = vld [vmem:[%s979_s5 + $0x38] sm:$0xff]  ;;  %v323_v45 = vld [vmem:[%s978_s4 + $0x48] sm:$0xff]  ;;  %v324_v46 = vld [vmem:[%s978_s4 + $0x50] sm:$0xff]  ;;  %p633_p4 = pnand %p632_p3, %p626_p0 }
  0x1c   :  { %334 = vperm.xlu1 %624, %v315_v27   ;;  %329 = vperm.xlu0 %623, %v314_v28   ;;  %v55_v47 = vld [vmem:[%s977_s3 + $0x60] sm:$0xf]  ;;  %v325_v48 = vld [vmem:[%s978_s4 + $0x58] sm:$0xff]  ;;  %v427_v51 = vld [vmem:[%s979_s5 + $0x48] sm:$0xff] }
  0x1d   :  { %v426_v49 = vld [vmem:[%s979_s5 + $0x40] sm:$0xff]  ;;  %v429_v52 = vld [vmem:[%s979_s5 + $0x58] sm:$0xff]  ;;  %v428_v53 = vld [vmem:[%s979_s5 + $0x50] sm:$0xff] }
  0x1e   :  { %597 = vmatmul.mubr.msk.f32.gmra.mrb[12].mxu0 %vm140_vm2, %v36_v29  ;;  %v326_v50 = vld [vmem:[%s978_s4 + $0x60] sm:$0xf] }
  0x1f   :  { %v430_v54 = vld [vmem:[%s979_s5 + $0x60] sm:$0xf] }
  0x20   :  { %344 = vperm.xlu1 %624, %v317_v30   ;;  %339 = vperm.xlu0 %623, %v316_v31   ;;  %v918_v16 = vld [vmem:[%s975_s1] ss:$0 sm:$0xff] }
  0x24   :  { %438 = vperm.xlu1 %624, %v419_v32   ;;  %433 = vperm.xlu0 %623, %v418_v33  }
  0x28   :  { %443 = vperm.xlu1 %624, %v420_v34   ;;  %349 = vperm.xlu0 %623, %v318_v35  }
  0x2c   :  { %448 = vperm.xlu1 %624, %v421_v36   ;;  %354 = vperm.xlu0 %623, %v319_v37  }
  0x30   :  { %453 = vperm.xlu1 %624, %v422_v38   ;;  %359 = vperm.xlu0 %623, %v320_v39  }
  0x34   :  { %458 = vperm.xlu1 %624, %v423_v40   ;;  %364 = vperm.xlu0 %623, %v321_v41  }
  0x38   :  { %463 = vperm.xlu1 %624, %v424_v42   ;;  %369 = vperm.xlu0 %623, %v322_v43  }
  0x3c   :  { %468 = vperm.xlu1 %624, %v425_v44   ;;  %374 = vperm.xlu0 %623, %v323_v45  }
  0x40   :  { %379 = vperm.xlu1 %624, %v324_v46   ;;  %118 = vperm.xlu0 %623, %v55_v47  }
  0x44   :  { %384 = vperm.xlu1 %624, %v325_v48   ;;  %473 = vperm.xlu0 %623, %v426_v49  }
  0x48   :  { %389 = vperm.xlu1 %624, %v326_v50   ;;  %478 = vperm.xlu0 %623, %v427_v51  }
  0x4c   :  { %488 = vperm.xlu1 %624, %v429_v52   ;;  %483 = vperm.xlu0 %623, %v428_v53  }
  0x50   :  { %493 = vperm.xlu0 %623, %v430_v54  }
  0x83   :  { %v59_v55 = vpop.permute.xlu0 %58  ;;  %v69_v56 = vpop.permute.xlu1 %68 }
  0x84   :  { %v127_v19 = vmul.f32 %v918_v16, %v59_v55  ;;  %v129_v34 = vmul.f32 %v918_v16, %v69_v56 }
  0x87   :  { %v64_v57 = vpop.permute.xlu0 %63  ;;  %v74_v58 = vpop.permute.xlu1 %73 }
  0x88   :  { %v128_v25 = vmul.f32 %v918_v16, %v64_v57  ;;  %v130_v43 = vmul.f32 %v918_v16, %v74_v58 }
  0x8b   :  { %v79_v59 = vpop.permute.xlu0 %78  ;;  %v893_v60 = vpop.permute.xlu1 %83 }
  0x8c   :  { %v131_v56 = vmul.f32 %v918_v16, %v79_v59 }
  0x8f   :  { %v895_v61 = vpop.permute.xlu0 %88  ;;  %v897_v62 = vpop.permute.xlu1 %93 }
  0x93   :  { %v899_v63 = vpop.permute.xlu0 %98  ;;  %v901_v0 = vpop.permute.xlu1 %103 }
  0x97   :  { %v903_v1 = vpop.permute.xlu0 %108  ;;  %v905_v2 = vpop.permute.xlu1 %113 }
  0x9b   :  { %v330_v3 = vpop.permute.xlu0 %329  ;;  %v335_v4 = vpop.permute.xlu1 %334 }
  0x9f   :  { %v340_v5 = vpop.permute.xlu0 %339  ;;  %v345_v6 = vpop.permute.xlu1 %344 }
  0xa3   :  { %v434_v7 = vpop.permute.xlu0 %433  ;;  %v439_v8 = vpop.permute.xlu1 %438 }
  0xa7   :  { %v350_v9 = vpop.permute.xlu0 %349  ;;  %v444_v10 = vpop.permute.xlu1 %443 }
  0xab   :  { %v907_v11 = vpop.permute.xlu0 %354  ;;  %v449_v12 = vpop.permute.xlu1 %448 }
  0xaf   :  { %v909_v13 = vpop.permute.xlu0 %359  ;;  %v911_v14 = vpop.permute.xlu1 %453 }
  0xb3   :  { %v913_v15 = vpop.permute.xlu0 %364  ;;  %v920_v17 = vpop.permute.xlu1 %458 }
  0xb7   :  { %v922_v18 = vpop.permute.xlu0 %369  ;;  %v926_v26 = vpop.permute.xlu1 %463 }
  0xbb   :  { %v928_v27 = vpop.permute.xlu0 %374  ;;  %v932_v44 = vpop.permute.xlu1 %468 }
  0xbf   :  { %v119_v45 = vpop.permute.xlu0 %118 }
  0xd9   :  { %v250_v20 = vpop.f32.mrb[0].mxu0  ;;  %v285_v21 = vpop.f32.mrb[0].mxu1 }
  0xda   :  { %v251_v22 = vadd.f32 %v250_v20, %v127_v19  ;;  %v580_v23 = vpop.f32.mrb[1].mxu0  ;;  %v601_v24 = vpop.f32.mrb[1].mxu1 }
  0xdb   :  { %v380_v24 = vpop.permute.xlu1 %379 }
  0xdc   :  { %v392_v28 = vadd.f32 %v330_v3, %v251_v22 }
  0xdd   :  { %v255_v29 = vpop.f32.mrb[2].mxu0  ;;  %v290_v30 = vpop.f32.mrb[2].mxu1 }
  0xde   :  { %v256_v31 = vadd.f32 %v255_v29, %v128_v25  ;;  %v583_v32 = vpop.f32.mrb[3].mxu0  ;;  %v604_v33 = vpop.f32.mrb[3].mxu1  ;;  %v405_v35 = vmax.f32 %v392_v28, 0.0 }
  0xdf   :  { %v474_v25 = vpop.permute.xlu0 %473 }
  0xe0   :  { %v393_v36 = vadd.f32 %v335_v4, %v256_v31  ;;  %v496_v46 = vmul.f32 %v434_v7, %v405_v35  ;;  %v135_v31 = vmul.f32 %v918_v16, %v899_v63 }
  0xe1   :  { %v260_v37 = vpop.f32.mrb[4].mxu0  ;;  %v295_v38 = vpop.f32.mrb[4].mxu1 }
  0xe2   :  { %v406_v39 = vmax.f32 %v393_v36, 0.0  ;;  %v261_v40 = vadd.f32 %v260_v37, %v129_v34  ;;  %v586_v41 = vpop.f32.mrb[5].mxu0  ;;  %v607_v42 = vpop.f32.mrb[5].mxu1  ;;  %v291_v37 = vadd.f32 %v290_v30, %v135_v31  ;;  %v139_v30 = vmul.f32 %v918_v16, %v119_v45 }
  0xe4   :  { %v497_v47 = vmul.f32 %v439_v8, %v406_v39  ;;  %v394_v48 = vadd.f32 %v340_v5, %v261_v40  ;;  %v134_v5 = vmul.f32 %v918_v16, %v897_v62  ;;  %v132_v8 = vmul.f32 %v918_v16, %v893_v60  ;;  %v385_v40 = vpop.permute.xlu1 %384 }
  0xe5   :  { %v265_v49 = vpop.f32.mrb[6].mxu0  ;;  %v300_v50 = vpop.f32.mrb[6].mxu1  ;;  %v133_v62 = vmul.f32 %v918_v16, %v895_v61  ;;  %v136_v60 = vmul.f32 %v918_v16, %v901_v0  ;;  %v138_v0 = vmul.f32 %v918_v16, %v905_v2 }
  0xe6   :  { %v509_v51 = vadd.f32 %v497_v47, %v496_v46  ;;  %v407_v52 = vmax.f32 %v394_v48, 0.0  ;;  %v266_v53 = vadd.f32 %v265_v49, %v130_v43  ;;  %v589_v54 = vpop.f32.mrb[7].mxu0  ;;  %v610_v55 = vpop.f32.mrb[7].mxu1  ;;  %v286_v59 = vadd.f32 %v285_v21, %v134_v5 }
  0xe7   :  { %v137_v21 = vmul.f32 %v918_v16, %v903_v1  ;;  %v296_v41 = vadd.f32 %v295_v38, %v136_v60 }
  0xe8   :  { %v498_v57 = vmul.f32 %v444_v10, %v407_v52  ;;  %v395_v3 = vadd.f32 %v345_v6, %v266_v53  ;;  %v399_v63 = vadd.f32 %v913_v15, %v286_v59  ;;  %v390_v54 = vpop.permute.xlu1 %389 }
  0xe9   :  { %v270_v4 = vpop.f32.mrb[8].mxu0  ;;  %v305_v19 = vpop.f32.mrb[8].mxu1  ;;  %v301_v47 = vadd.f32 %v300_v50, %v137_v21  ;;  %v401_v38 = vadd.f32 %v928_v27, %v296_v41 }
  0xea   :  { %v510_v58 = vadd.f32 %v509_v51, %v498_v57  ;;  %v408_v20 = vmax.f32 %v395_v3, 0.0  ;;  %v271_v22 = vadd.f32 %v270_v4, %v131_v56  ;;  %v592_v23 = vpop.f32.mrb[9].mxu0  ;;  %v613_v7 = vpop.f32.mrb[9].mxu1  ;;  %v412_v48 = vmax.f32 %v399_v63, 0.0 }
  0xeb   :  { %v306_v51 = vadd.f32 %v305_v19, %v138_v0  ;;  %v402_v2 = vadd.f32 %v380_v24, %v301_v47  ;;  %v414_v50 = vmax.f32 %v401_v38, 0.0 }
  0xec   :  { %v499_v28 = vmul.f32 %v449_v12, %v408_v20  ;;  %v396_v29 = vadd.f32 %v350_v9, %v271_v22  ;;  %v489_v5 = vpop.permute.xlu1 %488 }
  0xed   :  { %v275_v10 = vpop.f32.mrb[10].mxu0  ;;  %v310_v6 = vpop.f32.mrb[10].mxu1  ;;  %v415_v3 = vmax.f32 %v402_v2, 0.0 }
  0xee   :  { %v511_v32 = vadd.f32 %v510_v58, %v499_v28  ;;  %v409_v33 = vmax.f32 %v396_v29, 0.0  ;;  %v276_v34 = vadd.f32 %v275_v10, %v132_v8  ;;  %v595_v35 = vpop.f32.mrb[11].mxu0  ;;  %v616_v36 = vpop.f32.mrb[11].mxu1  ;;  %v311_v49 = vadd.f32 %v310_v6, %v139_v30 }
  0xf0   :  { %v500_v9 = vmul.f32 %v911_v14, %v409_v33  ;;  %v397_v12 = vadd.f32 %v907_v11, %v276_v34  ;;  %v479_v14 = vpop.permute.xlu0 %478  ;;  %v400_v11 = vadd.f32 %v922_v18, %v291_v37  ;;  %v404_v45 = vadd.f32 %v390_v54, %v311_v49 }
  0xf1   :  { %v280_v39 = vpop.f32.mrb[12].mxu0  ;;  %v503_v18 = vmul.f32 %v932_v44, %v412_v48  ;;  %v505_v27 = vmul.f32 %v479_v14, %v414_v50 }
  0xf2   :  { %v512_v42 = vadd.f32 %v511_v32, %v500_v9  ;;  %v410_v43 = vmax.f32 %v397_v12, 0.0  ;;  %v281_v46 = vadd.f32 %v280_v39, %v133_v62  ;;  %v598_v61 = vpop.f32.mrb[13].mxu0  ;;  %v413_v55 = vmax.f32 %v400_v11, 0.0 }
  0xf3   :  { %v417_v58 = vmax.f32 %v404_v45, 0.0  ;;  %v530_v32 = vstv %s980_s6 }
  0xf4   :  { %v501_v1 = vmul.f32 %v920_v17, %v410_v43  ;;  %v398_v15 = vadd.f32 %v909_v13, %v281_v46  ;;  %v484_v56 = vpop.permute.xlu0 %483  ;;  %v403_v17 = vadd.f32 %v385_v40, %v306_v51  ;;  %v504_v13 = vmul.f32 %v474_v25, %v413_v55 }
  0xf5   :  { %v506_v23 = vmul.f32 %v484_v56, %v415_v3 }
  0xf6   :  { %v513_v52 = vadd.f32 %v512_v42, %v501_v1  ;;  %v411_v53 = vmax.f32 %v398_v15, 0.0  ;;  %v416_v19 = vmax.f32 %v403_v17, 0.0 }
  0xf8   :  { %v502_v16 = vmul.f32 %v926_v26, %v411_v53  ;;  %v494_v22 = vpop.permute.xlu0 %493  ;;  %v507_v26 = vmul.f32 %v489_v5, %v416_v19 }
  0xf9   :  { %v508_v8 = vmul.f32 %v494_v22, %v417_v58 }
  0xfa   :  { %v514_v57 = vadd.f32 %v513_v52, %v502_v16 }
  0xfb   :  { %v521_v44 = vsel %vm520_vm3, %v508_v8, 0.0 }
  0xfc   :  { %v515_v4 = vadd.f32 %v514_v57, %v503_v18 }
  0xfe   :  { %v516_v20 = vadd.f32 %v515_v4, %v504_v13 }
 0x100   :  { %v517_v7 = vadd.f32 %v516_v20, %v505_v27 }
 0x102   :  { %v518_v24 = vadd.f32 %v517_v7, %v506_v23 }
 0x104   :  { %v519_v28 = vadd.f32 %v518_v24, %v507_v26 }
 0x106   :  { %v522_v29 = vadd.f32 %v521_v44, %v519_v28 }
 0x108   :  { %v523_v59 = vrot.slane %v522_v29, 4 }
 0x10a   :  { %v524_v10 = vadd.f32 %v523_v59, %v522_v29 }
 0x10c   :  { %v525_v25 = vrot.slane %v524_v10, 2 }
 0x10e   :  { %v526_v6 = vadd.f32 %v525_v25, %v524_v10 }
 0x110   :  { %v527_v31 = vrot.slane %v526_v6, 1 }
 0x112   :  { %v528_v33 = vadd.f32 %v527_v31, %v526_v6 }
 0x114   :  { %v531_v34 = vadd.f32 %v530_v32, %v528_v33 }
 0x116   :  { %532 = vst [vmem:[#allocation3] sm:$0x1] %v531_v34 }
 0x117   :  { %636 = shalt.err (!%p633_p4)
}
 0x118   :  { %s637_s14 = scalar_lea.hbm %s981_s7, 16 }
 0x119   :  { %p638_p5 = scmp.ne.s32.totalorder %s981_s7, %s637_s14  ;;  %p641_p6 = scmp.lt.u32.totalorder %s637_s14, %s981_s7 }
 0x11b   :  { %p643_p7 = pnand %p641_p6, %p638_p5 }
 0x11d   :  { %646 = shalt.err (!%p643_p7)
}
 0x11e   :  { %542 = dma.vmem_to_hbm [thread:$0]  %s540_s10, 16, %s981_s7, [#allocation4]  }
 0x11f   :  { %647 = dma.done.wait [#allocation4], 16  }
 0x120   :  { %648 = vsyncadd [#allocation4], 4294967280 }
 0x121   :  { %546 = vsyncpa [#allocation4], 1 }

</bundles_post_ra>
